<compile_context>
chip_gen: v6e
topology: v6e:2x2x1
jax: 0.10.0
libtpu: 0.0.40
codegen_flags: <defaults>
</compile_context>

<pallas_src>
import functools

import jax
import jax.numpy as jnp
from jax.experimental import pallas as pl
from jax.experimental.pallas import tpu as pltpu


def _vmem_limit_bytes():
    """Generation-aware VMEM limit: ~75% of physical (48 MiB on v7x, 96 MiB on v5e/v6e)."""
    try:
        cap = int(pltpu.get_tpu_info().vmem_capacity_bytes)
    except Exception:
        cap = 64 * 1024 * 1024
    return max(32 * 1024 * 1024, min(cap * 3 // 4, 100 * 1024 * 1024))


def _full_spec(arr):
    """Full-array block that stays resident across a grid (constant index_map)."""
    zeros = (0,) * arr.ndim
    return pl.BlockSpec(arr.shape, lambda *_, _z=zeros: _z)
    # TODO(synk): pipeline_mode=pl.Buffered(1) would halve the weight-buffer footprint.


def _pick_tile(dim, target, align):
    """Largest block <= target that divides `dim` and is a multiple of `align`.
    Falls back to the full dim (always a legal block) so grids divide exactly."""
    if dim <= target:
        return dim
    t = (target // align) * align
    while t >= align:
        if dim % t == 0:
            return t
        t -= align
    return dim


# ---------------------------------------------------------------------------
# Pallas kernels
# ---------------------------------------------------------------------------
def revin_norm_kernel(x_ref, w_ref, b_ref, y_ref, mean_ref, std_ref):
    # x: (tile_rows, L) -- one row per (batch, channel); time on the 128-lane axis.
    x = x_ref[...]
    mean = jnp.mean(x, axis=-1, keepdims=True)
    var = jnp.mean((x - mean) ** 2, axis=-1, keepdims=True)   # biased var (matches RevIN)
    std = jnp.sqrt(var + 1e-5)
    y_ref[...] = (x - mean) / std * w_ref[...] + b_ref[...]
    mean_ref[...] = mean
    std_ref[...] = std


def revin_denorm_kernel(x_ref, w_ref, b_ref, mean_ref, std_ref, y_ref):
    # x: (tile_rows, tw); w/b/mean/std: (tile_rows, 1)
    x = x_ref[...] - b_ref[...]
    x = x / (w_ref[...] + 1e-5 * 1e-5)   # eps*eps matches the RevIN reference
    y_ref[...] = x * std_ref[...] + mean_ref[...]


def linear_bias_kernel(x_ref, w_ref, b_ref, o_ref):
    # tiled y = x @ W + b; f32 output block is the accumulator (resident across k)
    @pl.when(pl.program_id(2) == 0)
    def _():
        o_ref[...] = jnp.zeros_like(o_ref)

    o_ref[...] += jnp.dot(x_ref[...].astype(jnp.bfloat16), w_ref[...],
                          preferred_element_type=jnp.float32)

    @pl.when(pl.program_id(2) == pl.num_programs(2) - 1)
    def _():
        o_ref[...] += b_ref[...]


def linear_relu_res_kernel(x_ref, w_ref, b_ref, res_ref, o_ref):
    # tiled y = relu(x @ W + b) + res  (Flatten_Head residual block)
    @pl.when(pl.program_id(2) == 0)
    def _():
        o_ref[...] = jnp.zeros_like(o_ref)

    o_ref[...] += jnp.dot(x_ref[...].astype(jnp.bfloat16), w_ref[...],
                          preferred_element_type=jnp.float32)

    @pl.when(pl.program_id(2) == pl.num_programs(2) - 1)
    def _():
        o_ref[...] = jax.nn.relu(o_ref[...] + b_ref[...]) + res_ref[...]


def _layernorm(x, g, b, eps=1e-5):
    mean = jnp.mean(x, axis=-1, keepdims=True)
    var = jnp.mean((x - mean) ** 2, axis=-1, keepdims=True)
    return (x - mean) * jax.lax.rsqrt(var + eps) * g + b


def _gelu(x):
    # TODO(synk): PyTorch nn.GELU uses the exact erf form; tanh approximation kept for Mosaic compat.
    return jax.nn.gelu(x, approximate=True)


def trans_c_kernel(x_ref, wpe_ref, bpe_ref,
                   ln1g_ref, ln1b_ref, wqkv_ref, bqkv_ref, wo_ref, bo_ref,
                   ln2g_ref, ln2b_ref, wf1_ref, bf1_ref, wf2_ref, bf2_ref,
                   wh_ref, bh_ref, o_ref,
                   *, depth, heads, dim_head, n_tokens, tile_bn):
    """Trans_C forward on a tile of `tile_bn` (batch*patch) rows:
    patch embedding -> depth x (PreNorm attn + PreNorm FF) -> mlp_head."""
    cdt = jnp.bfloat16
    x3 = x_ref[...]                                   # (tile_bn, n, 2*patch_len)
    patch_dim = x3.shape[-1]
    x = x3.reshape(tile_bn * n_tokens, patch_dim)
    x = jnp.dot(x.astype(cdt), wpe_ref[...],
                preferred_element_type=jnp.float32) + bpe_ref[...]
    inner = heads * dim_head
    scale = 1.0 / (dim_head ** 0.5)

    # TODO(synk): convert to lax.fori_loop over stacked weights once depth > 2
    for l in range(depth):
        # --- PreNorm + c_Attention (fused QKV projection, head-batched attention) ---
        xn = _layernorm(x, ln1g_ref[l], ln1b_ref[l])
        qkv = jnp.dot(xn.astype(cdt), wqkv_ref[l],
                      preferred_element_type=jnp.float32) + bqkv_ref[l]
        qkv3 = qkv.reshape(tile_bn, n_tokens, 3 * inner)

        def heads_to_batch(base):
            # (tile_bn, n, inner) cols (h,d) -> (heads*tile_bn, n, dim_head), batch order (h, b)
            return jnp.concatenate(
                [qkv3[:, :, base + h * dim_head: base + (h + 1) * dim_head]
                 for h in range(heads)], axis=0)

        q = heads_to_batch(0)
        k = heads_to_batch(inner)
        v = heads_to_batch(2 * inner)

        # one batched QK^T einsum + one batched PV einsum per layer (instead of `heads` small ones)
        dots = jnp.einsum('bid,bjd->bij', q.astype(cdt), k.astype(cdt),
                          preferred_element_type=jnp.float32) * scale
        dots = dots - jnp.max(dots, axis=-1, keepdims=True)
        e = jnp.exp(dots)
        attn = e * pl.reciprocal(jnp.sum(e, axis=-1, keepdims=True), approx=True)
        out = jnp.einsum('bij,bjd->bid', attn.astype(cdt), v.astype(cdt),
                         preferred_element_type=jnp.float32)
        # undo the (h, b) batch order with a lane concat -> (tile_bn*n, inner)
        out2d = jnp.concatenate(
            [out[h * tile_bn:(h + 1) * tile_bn] for h in range(heads)], axis=-1)
        out2d = out2d.reshape(tile_bn * n_tokens, inner)
        # single full-K (inner -> dim) output projection on the MXU
        x = jnp.dot(out2d.astype(cdt), wo_ref[l],
                    preferred_element_type=jnp.float32) + bo_ref[l] + x

        # --- PreNorm + FeedForward ---
        xn = _layernorm(x, ln2g_ref[l], ln2b_ref[l])
        hdn = _gelu(jnp.dot(xn.astype(cdt), wf1_ref[l],
                            preferred_element_type=jnp.float32) + bf1_ref[l])
        x = jnp.dot(hdn.astype(cdt), wf2_ref[l],
                    preferred_element_type=jnp.float32) + bf2_ref[l] + x

    # mlp_head
    y = jnp.dot(x.astype(cdt), wh_ref[...],
                preferred_element_type=jnp.float32) + bh_ref[...]
    dm2 = y.shape[-1]
    y3 = y.reshape(tile_bn, n_tokens, dm2)
    # Lane-dense 2-D output block: HBM writeback rows are n_tokens*dm2 wide.
    # Per-token slice stores keep all ops in well-supported territory (no minor-dim reshape);
    # for dm2 % 128 == 0 the VMEM stores are unmasked and 128-aligned as well.
    for c in range(n_tokens):
        o_ref[:, c * dm2:(c + 1) * dm2] = y3[:, c, :]


# ---------------------------------------------------------------------------
# Pallas call wrappers
# ---------------------------------------------------------------------------
def pallas_revin_norm(z, w, b, vmem_limit):
    B, C, L = z.shape
    rows = B * C
    x2 = z.reshape(rows, L)
    wf = jnp.broadcast_to(jnp.reshape(w, (1, C, 1)), (B, C, 1)).reshape(rows, 1)
    bf = jnp.broadcast_to(jnp.reshape(b, (1, C, 1)), (B, C, 1)).reshape(rows, 1)
    tr = _pick_tile(rows, 512, 8)
    grid = (rows // tr,)
    y, mean, std = pl.pallas_call(
        revin_norm_kernel,
        out_shape=(jax.ShapeDtypeStruct((rows, L), jnp.float32),
                   jax.ShapeDtypeStruct((rows, 1), jnp.float32),
                   jax.ShapeDtypeStruct((rows, 1), jnp.float32)),
        grid=grid,
        in_specs=[pl.BlockSpec((tr, L), lambda i: (i, 0)),
                  pl.BlockSpec((tr, 1), lambda i: (i, 0)),
                  pl.BlockSpec((tr, 1), lambda i: (i, 0))],
        out_specs=(pl.BlockSpec((tr, L), lambda i: (i, 0)),
                   pl.BlockSpec((tr, 1), lambda i: (i, 0)),
                   pl.BlockSpec((tr, 1), lambda i: (i, 0))),
        compiler_params=pltpu.CompilerParams(
            dimension_semantics=("parallel",),
            vmem_limit_bytes=vmem_limit),
    )(x2, wf, bf)
    return y.reshape(B, C, L), mean, std


def pallas_revin_denorm(x, w, b, mean, std, vmem_limit):
    B, C, T = x.shape
    rows = B * C
    x2 = x.reshape(rows, T)
    wf = jnp.broadcast_to(jnp.reshape(w, (1, C, 1)), (B, C, 1)).reshape(rows, 1)
    bf = jnp.broadcast_to(jnp.reshape(b, (1, C, 1)), (B, C, 1)).reshape(rows, 1)
    tr = _pick_tile(rows, 512, 8)
    grid = (rows // tr,)
    y = pl.pallas_call(
        revin_denorm_kernel,
        out_shape=jax.ShapeDtypeStruct((rows, T), jnp.float32),
        grid=grid,
        in_specs=[pl.BlockSpec((tr, T), lambda i: (i, 0)),
                  pl.BlockSpec((tr, 1), lambda i: (i, 0)),
                  pl.BlockSpec((tr, 1), lambda i: (i, 0)),
                  pl.BlockSpec((tr, 1), lambda i: (i, 0)),
                  pl.BlockSpec((tr, 1), lambda i: (i, 0))],
        out_specs=pl.BlockSpec((tr, T), lambda i: (i, 0)),
        compiler_params=pltpu.CompilerParams(
            dimension_semantics=("parallel",),
            vmem_limit_bytes=vmem_limit),
    )(x2, wf, bf, mean, std)
    return y.reshape(B, C, T)


def pallas_linear(x2d, w, b, res=None, *, vmem_limit):
    """Tiled  y = x @ W + b  (optionally  y = relu(x @ W + b) + res)."""
    M, K = x2d.shape
    N = w.shape[1]
    big_vmem = vmem_limit >= 80 * 1024 * 1024
    tn = _pick_tile(N, 1024 if big_vmem else 512, 128)
    tk = _pick_tile(K, 1024 if big_vmem else 512, 128)
    tm_target = 256
    # keep >= 2 blocks on some parallel axis for megacore sharding when M is small
    if N // tn < 2 and M >= 16:
        tm_target = min(tm_target, max(8, (M // 2) // 8 * 8))
    tm = _pick_tile(M, tm_target, 8)
    grid = (M // tm, N // tn, K // tk)

    x_spec = pl.BlockSpec((tm, tk), lambda i, j, k: (i, k))
    w_spec = pl.BlockSpec((tk, tn), lambda i, j, k: (k, j))
    b_spec = pl.BlockSpec((1, tn), lambda i, j, k: (0, j))
    o_spec = pl.BlockSpec((tm, tn), lambda i, j, k: (i, j))

    if res is None:
        kernel = linear_bias_kernel
        in_specs = [x_spec, w_spec, b_spec]
        args = (x2d, w, b)
    else:
        kernel = linear_relu_res_kernel
        in_specs = [x_spec, w_spec, b_spec,
                    pl.BlockSpec((tm, tn), lambda i, j, k: (i, j))]
        args = (x2d, w, b, res)

    return pl.pallas_call(
        kernel,
        out_shape=jax.ShapeDtypeStruct((M, N), jnp.float32),
        grid=grid,
        in_specs=in_specs,
        out_specs=o_spec,
        compiler_params=pltpu.CompilerParams(
            dimension_semantics=("parallel", "parallel", "arbitrary"),
            vmem_limit_bytes=vmem_limit),
    )(*args)


def pallas_flatten_head(x2d, hp, vmem_limit):
    # x -> relu(xW1+b1)+x -> relu(.W2+b2)+. -> relu(.W3+b3)+. -> .W4+b4
    x1 = pallas_linear(x2d, hp['w1'], hp['b1'], res=x2d, vmem_limit=vmem_limit)
    x2 = pallas_linear(x1, hp['w2'], hp['b2'], res=x1, vmem_limit=vmem_limit)
    x3 = pallas_linear(x2, hp['w3'], hp['b3'], res=x2, vmem_limit=vmem_limit)
    return pallas_linear(x3, hp['w4'], hp['b4'], vmem_limit=vmem_limit)


def _trans_c_tile_bn(bn, C, p_dim, cfg, dm2, weights, vmem_limit):
    """tile_bn from the VMEM budget: resident (double-buffered) weights + per-row activations."""
    heads = cfg['cf_heads']
    dim = cfg['cf_dim']
    mlp = cfg['cf_mlp']
    inner = heads * cfg['cf_head_dim']
    w_bytes = 2 * sum(int(w.size) * w.dtype.itemsize for w in weights)
    budget = int(vmem_limit * 0.8) - w_bytes
    # rough f32 activation footprint per bn row (qkv, q/k/v, scores, ff hidden, io blocks)
    per_row = 4 * (C * (6 * p_dim + 5 * dim + 6 * inner + 3 * mlp + 4 * dm2)
                   + 3 * heads * C * C)
    max_rows = budget // max(per_row, 1)
    target = int(max(8, min(max_rows, 128)))
    if bn >= 16:                      # keep >= 2 grid blocks for megacore / DMA pipelining
        target = min(target, max(8, (bn // 2) // 8 * 8))
    return _pick_tile(bn, target, 8)


def pallas_trans_c(x, params, cfg, bn, C, dm2, vmem_limit):
    p_dim = x.shape[-1]
    weights = [params['wpe'], params['bpe'],
               params['ln1g'], params['ln1b'],
               params['wqkv'], params['bqkv'],
               params['wo'], params['bo'],
               params['ln2g'], params['ln2b'],
               params['wf1'], params['bf1'], params['wf2'], params['bf2'],
               params['wh'], params['bh']]
    tile_bn = _trans_c_tile_bn(bn, C, p_dim, cfg, dm2, weights, vmem_limit)
    grid = (bn // tile_bn,)

    kern = functools.partial(
        trans_c_kernel, depth=cfg['cf_depth'], heads=cfg['cf_heads'],
        dim_head=cfg['cf_head_dim'], n_tokens=C, tile_bn=tile_bn)

    in_specs = ([pl.BlockSpec((tile_bn, C, p_dim), lambda i: (i, 0, 0))]
                + [_full_spec(w) for w in weights])
    # lane-dense 2-D output (bn, C*dm2); the (bn, C, dm2) view is free in the wrapper
    out_spec = pl.BlockSpec((tile_bn, C * dm2), lambda i: (i, 0))

    return pl.pallas_call(
        kern,
        out_shape=jax.ShapeDtypeStruct((bn, C * dm2), jnp.float32),
        grid=grid,
        in_specs=in_specs,
        out_specs=out_spec,
        compiler_params=pltpu.CompilerParams(
            dimension_semantics=("parallel",),
            vmem_limit_bytes=vmem_limit),
    )(x, *weights)


# ---------------------------------------------------------------------------
# Full forward pass
# ---------------------------------------------------------------------------
def fredformer_forward(z, params, cfg):
    B, C, L = z.shape
    p_len, stride = cfg['patch_len'], cfg['stride']
    patch_num = (L - p_len) // stride + 1
    tw = cfg['target_window']
    dm2 = cfg['d_model'] * 2
    vmem_limit = _vmem_limit_bytes()

    # ---- RevIN 'norm' (Pallas, gridded over B*C rows; channel-first layout kept) ----
    zn, mean, std = pallas_revin_norm(z, params['revin_w'], params['revin_b'], vmem_limit)

    # ---- FFT (glue; spectral transform, not a matmul hot path) ----
    zf = jnp.fft.fft(zn, axis=-1)
    z1 = jnp.real(zf).astype(jnp.float32)
    z2 = jnp.imag(zf).astype(jnp.float32)

    # ---- unfold + patch regrouping (glue) ----
    idx = jnp.arange(patch_num)[:, None] * stride + jnp.arange(p_len)[None, :]
    z1 = z1[..., idx]                                             # (B, C, pn, pl)
    z2 = z2[..., idx]
    z1 = jnp.transpose(z1, (0, 2, 1, 3)).reshape(B * patch_num, C, p_len)
    z2 = jnp.transpose(z2, (0, 2, 1, 3)).reshape(B * patch_num, C, p_len)
    x = jnp.concatenate([z1, z2], axis=-1)                        # (B*pn, C, 2*pl)

    bn = B * patch_num

    # ---- Trans_C frequency transformer (Pallas, gridded over bn, lane-dense output) ----
    zt = pallas_trans_c(x, params, cfg, bn, C, dm2, vmem_limit)   # (bn, C*dm2)

    # ---- get_r / get_i fused into one tiled matmul ----
    z2d = zt.reshape(bn * C, dm2)                                 # free contiguous view
    zri = pallas_linear(z2d, params['get_ri_w'], params['get_ri_b'], vmem_limit=vmem_limit)
    zr, zi = zri[:, :dm2], zri[:, dm2:]

    # TODO(synk): fold this transpose into the get_ri out_spec / Flatten_Head in_spec index_maps
    # to drop two full HBM passes over the activations.
    def regroup(a):
        a = a.reshape(B, patch_num, C, dm2)
        a = jnp.transpose(a, (0, 2, 1, 3))                        # (B, C, pn, dm2)
        return a.reshape(B * C, patch_num * dm2)                  # Flatten(start_dim=-2)

    zr = regroup(zr)
    zi = regroup(zi)

    # ---- Flatten_Head x2 (tiled residual MLPs, bf16 weight streaming) ----
    h1 = pallas_flatten_head(zr, params['h1'], vmem_limit).reshape(B, C, tw)
    h2 = pallas_flatten_head(zi, params['h2'], vmem_limit).reshape(B, C, tw)

    # ---- iFFT (glue) ----
    zc = jnp.fft.ifft(h1 + 1j * h2, axis=-1)
    zcat = jnp.concatenate([jnp.real(zc).astype(jnp.float32),
                            jnp.imag(zc).astype(jnp.float32)], axis=-1)

    # ---- ircom (tiled Pallas linear) ----
    zo = pallas_linear(zcat.reshape(B * C, 2 * tw),
                       params['ircom_w'], params['ircom_b'],
                       vmem_limit=vmem_limit).reshape(B, C, tw)

    # ---- RevIN 'denorm' (Pallas, gridded) ----
    zo = pallas_revin_denorm(zo, params['revin_w'], params['revin_b'], mean, std, vmem_limit)
    return zo                                                     # (B, C, tw)


# ---------------------------------------------------------------------------
# Deterministic parameter construction
# ---------------------------------------------------------------------------
def make_params(cfg, key):
    C = cfg['c_in']; p_len = cfg['patch_len']; dim = cfg['cf_dim']
    depth = cfg['cf_depth']; heads = cfg['cf_heads']; dh = cfg['cf_head_dim']
    mlp = cfg['cf_mlp']; dm2 = cfg['d_model'] * 2; tw = cfg['target_window']
    L = cfg['context_window']; stride = cfg['stride']
    patch_num = (L - p_len) // stride + 1
    nf = dm2 * patch_num
    inner = heads * dh

    keys = iter(jax.random.split(key, 64))

    def lin(fi, fo):
        k1, k2 = jax.random.split(next(keys))
        bound = 1.0 / (fi ** 0.5)
        w = jax.random.uniform(k1, (fi, fo), jnp.float32, -bound, bound)
        b = jax.random.uniform(k2, (1, fo), jnp.float32, -bound, bound)
        return w, b

    def lin_stack(d, fi, fo):
        ws, bs = [], []
        for _ in range(d):
            w, b = lin(fi, fo)
            ws.append(w); bs.append(b)
        return jnp.stack(ws), jnp.stack(bs)

    bf = jnp.bfloat16

    p = {}
    p['revin_w'] = jnp.ones((1, C, 1), jnp.float32)
    p['revin_b'] = jnp.zeros((1, C, 1), jnp.float32)

    wpe, p['bpe'] = lin(2 * p_len, dim)
    p['wpe'] = wpe.astype(bf)
    p['ln1g'] = jnp.ones((depth, 1, dim), jnp.float32)
    p['ln1b'] = jnp.zeros((depth, 1, dim), jnp.float32)
    p['ln2g'] = jnp.ones((depth, 1, dim), jnp.float32)
    p['ln2b'] = jnp.zeros((depth, 1, dim), jnp.float32)
    wq, bq = lin_stack(depth, dim, inner)
    wk, bk = lin_stack(depth, dim, inner)
    wv, bv = lin_stack(depth, dim, inner)
    # fused QKV projection (one MXU matmul per layer), bf16 weights
    p['wqkv'] = jnp.concatenate([wq, wk, wv], axis=-1).astype(bf)  # (depth, dim, 3*inner)
    p['bqkv'] = jnp.concatenate([bq, bk, bv], axis=-1)             # (depth, 1, 3*inner)
    wo, p['bo'] = lin_stack(depth, inner, dim)
    wf1, p['bf1'] = lin_stack(depth, dim, mlp)
    wf2, p['bf2'] = lin_stack(depth, mlp, dim)
    wh, p['bh'] = lin(dim, dm2)
    p['wo'] = wo.astype(bf); p['wf1'] = wf1.astype(bf)
    p['wf2'] = wf2.astype(bf); p['wh'] = wh.astype(bf)

    wr, br = lin(dm2, dm2)
    wi, bi = lin(dm2, dm2)
    # fused get_r / get_i projection
    p['get_ri_w'] = jnp.concatenate([wr, wi], axis=1).astype(bf)   # (dm2, 2*dm2)
    p['get_ri_b'] = jnp.concatenate([br, bi], axis=1)              # (1, 2*dm2)

    for name in ('h1', 'h2'):
        w1, b1 = lin(nf, nf); w2, b2 = lin(nf, nf); w3, b3 = lin(nf, nf)
        w4, b4 = lin(nf, tw)
        p[name] = dict(w1=w1.astype(bf), b1=b1, w2=w2.astype(bf), b2=b2,
                       w3=w3.astype(bf), b3=b3, w4=w4.astype(bf), b4=b4)

    ircom_w, p['ircom_b'] = lin(2 * tw, tw)
    p['ircom_w'] = ircom_w.astype(bf)
    return p


# ---------------------------------------------------------------------------
if __name__ == "__main__":
    cfg = dict(
        c_in=4, context_window=16, target_window=8,
        patch_len=8, stride=8, d_model=8,
        cf_dim=32, cf_depth=2, cf_heads=2, cf_head_dim=16, cf_mlp=32,
    )
    key = jax.random.PRNGKey(0)
    kp, kx = jax.random.split(key)
    params = make_params(cfg, kp)
    z = jax.random.normal(kx, (2, cfg['c_in'], cfg['context_window']), jnp.float32)

    out = fredformer_forward(z, params, cfg)
    out = jax.block_until_ready(out)

    assert out.shape == (2, cfg['c_in'], cfg['target_window']), out.shape
    assert bool(jnp.all(jnp.isfinite(out)))
    print("KERNEL_OK")
</pallas_src>

<mosaic_0001>
module attributes {stable_mosaic.version = 11 : i64} {
  func.func @revin_norm_kernel(%arg0: i32, %arg1: memref<8x16xf32, #tpu.memory_space<vmem>>, %arg2: memref<8x1xf32, #tpu.memory_space<vmem>>, %arg3: memref<8x1xf32, #tpu.memory_space<vmem>>, %arg4: memref<8x16xf32, #tpu.memory_space<vmem>>, %arg5: memref<8x1xf32, #tpu.memory_space<vmem>>, %arg6: memref<8x1xf32, #tpu.memory_space<vmem>>) attributes {dimension_semantics = [#tpu.dimension_semantics<parallel>], iteration_bounds = array<i64: 1>, scalar_prefetch = 0 : i64, scratch_operands = 0 : i64, tpu.core_type = #tpu.core_type<tc>, window_params = [{transform_indices = @transform_0, window_bounds = array<i64: 8, 16>}, {transform_indices = @transform_1, window_bounds = array<i64: 8, 1>}, {transform_indices = @transform_2, window_bounds = array<i64: 8, 1>}, {transform_indices = @transform_3, window_bounds = array<i64: 8, 16>}, {transform_indices = @transform_4, window_bounds = array<i64: 8, 1>}, {transform_indices = @transform_5, window_bounds = array<i64: 8, 1>}]} {
    %c0 = arith.constant 0 : index
    %c0_0 = arith.constant 0 : index
    %0 = vector.load %arg1[%c0, %c0_0] : memref<8x16xf32, #tpu.memory_space<vmem>>, vector<8x16xf32>
    %cst = arith.constant dense<0.000000e+00> : vector<8xf32>
    %1 = vector.multi_reduction <add>, %0, %cst [1] : vector<8x16xf32> to vector<8xf32>
    %2 = vector.shape_cast %1 : vector<8xf32> to vector<8x1xf32>
    %cst_1 = arith.constant 1.600000e+01 : f32
    %3 = vector.broadcast %cst_1 : f32 to vector<8x1xf32>
    %4 = arith.divf %2, %3 : vector<8x1xf32>
    %5 = vector.broadcast %4 : vector<8x1xf32> to vector<8x16xf32>
    %6 = arith.subf %0, %5 : vector<8x16xf32>
    %7 = arith.mulf %6, %6 : vector<8x16xf32>
    %cst_2 = arith.constant dense<0.000000e+00> : vector<8xf32>
    %8 = vector.multi_reduction <add>, %7, %cst_2 [1] : vector<8x16xf32> to vector<8xf32>
    %9 = vector.shape_cast %8 : vector<8xf32> to vector<8x1xf32>
    %cst_3 = arith.constant 1.600000e+01 : f32
    %10 = vector.broadcast %cst_3 : f32 to vector<8x1xf32>
    %11 = arith.divf %9, %10 : vector<8x1xf32>
    %cst_4 = arith.constant 9.99999974E-6 : f32
    %12 = vector.broadcast %cst_4 : f32 to vector<8x1xf32>
    %13 = arith.addf %11, %12 : vector<8x1xf32>
    %14 = math.sqrt %13 : vector<8x1xf32>
    %15 = vector.broadcast %4 : vector<8x1xf32> to vector<8x16xf32>
    %16 = arith.subf %0, %15 : vector<8x16xf32>
    %17 = vector.broadcast %14 : vector<8x1xf32> to vector<8x16xf32>
    %18 = arith.divf %16, %17 : vector<8x16xf32>
    %c0_5 = arith.constant 0 : index
    %c0_6 = arith.constant 0 : index
    %19 = vector.load %arg2[%c0_5, %c0_6] : memref<8x1xf32, #tpu.memory_space<vmem>>, vector<8x1xf32>
    %20 = vector.broadcast %19 : vector<8x1xf32> to vector<8x16xf32>
    %21 = arith.mulf %18, %20 : vector<8x16xf32>
    %c0_7 = arith.constant 0 : index
    %c0_8 = arith.constant 0 : index
    %22 = vector.load %arg3[%c0_7, %c0_8] : memref<8x1xf32, #tpu.memory_space<vmem>>, vector<8x1xf32>
    %23 = vector.broadcast %22 : vector<8x1xf32> to vector<8x16xf32>
    %24 = arith.addf %21, %23 : vector<8x16xf32>
    %c0_9 = arith.constant 0 : index
    %c0_10 = arith.constant 0 : index
    %25 = vector.load %arg4[%c0_9, %c0_10] : memref<8x16xf32, #tpu.memory_space<vmem>>, vector<8x16xf32>
    tpu.vector_store %arg4[%c0_9, %c0_10], %24 {strides = array<i32>} : memref<8x16xf32, #tpu.memory_space<vmem>>, vector<8x16xf32>,
    %c0_11 = arith.constant 0 : index
    %c0_12 = arith.constant 0 : index
    %26 = vector.load %arg5[%c0_11, %c0_12] : memref<8x1xf32, #tpu.memory_space<vmem>>, vector<8x1xf32>
    tpu.vector_store %arg5[%c0_11, %c0_12], %4 {strides = array<i32>} : memref<8x1xf32, #tpu.memory_space<vmem>>, vector<8x1xf32>,
    %c0_13 = arith.constant 0 : index
    %c0_14 = arith.constant 0 : index
    %27 = vector.load %arg6[%c0_13, %c0_14] : memref<8x1xf32, #tpu.memory_space<vmem>>, vector<8x1xf32>
    tpu.vector_store %arg6[%c0_13, %c0_14], %14 {strides = array<i32>} : memref<8x1xf32, #tpu.memory_space<vmem>>, vector<8x1xf32>,
    return
  }
  func.func @transform_0(%arg0: i32) -> (i32, i32) {
    %c0_i32 = arith.constant 0 : i32
    %c0_i32_0 = arith.constant 0 : i32
    return %arg0, %c0_i32 : i32, i32
  }
  func.func @transform_1(%arg0: i32) -> (i32, i32) {
    %c0_i32 = arith.constant 0 : i32
    %c0_i32_0 = arith.constant 0 : i32
    return %arg0, %c0_i32 : i32, i32
  }
  func.func @transform_2(%arg0: i32) -> (i32, i32) {
    %c0_i32 = arith.constant 0 : i32
    %c0_i32_0 = arith.constant 0 : i32
    return %arg0, %c0_i32 : i32, i32
  }
  func.func @transform_3(%arg0: i32) -> (i32, i32) {
    %c0_i32 = arith.constant 0 : i32
    %c0_i32_0 = arith.constant 0 : i32
    return %arg0, %c0_i32 : i32, i32
  }
  func.func @transform_4(%arg0: i32) -> (i32, i32) {
    %c0_i32 = arith.constant 0 : i32
    %c0_i32_0 = arith.constant 0 : i32
    return %arg0, %c0_i32 : i32, i32
  }
  func.func @transform_5(%arg0: i32) -> (i32, i32) {
    %c0_i32 = arith.constant 0 : i32
    %c0_i32_0 = arith.constant 0 : i32
    return %arg0, %c0_i32 : i32, i32
  }
}

</mosaic_0001>

<bundles_post_ra>
// kernel: tpu_custom_call.1
= control target key start
LH: loop header
LB: loop body
LE: loop exit
PB: predicated region body
PF: predicated region fallthrough
CT: control target
= control target key end

     0   :  { %vm19_vm0 = vcmask 130048   ;;  %s166_s0 = inlined_call_operand.vmem [shape: f32[8,16], index: 0, kind: input, shape index: {}]   ;;  %s167_s1 = inlined_call_operand.vmem [shape: f32[8,1], index: 1, kind: input, shape index: {}]   ;;  %s168_s2 = inlined_call_operand.vmem [shape: f32[8,1], index: 2, kind: input, shape index: {}]   ;;  %s169_s3 = inlined_call_operand.hbm [shape: f32[8,16], index: 3, kind: output, shape index: {0}]   ;;  %s170_s4 = inlined_call_operand.vmem [shape: f32[8,1], index: 4, kind: output, shape index: {1}]   ;;  %s171_s5 = inlined_call_operand.vmem [shape: f32[8,1], index: 5, kind: output, shape index: {2}]  }
   0x1   :  { %v18_v0 = vld [vmem:[%s166_s0] sm:$0xff] }
   0x2   :  { %11 = vsyncpa [#allocation3], 0  ;;  %v20_v1 = vsel %vm19_vm0, %v18_v0, 0.0  ;;  %v41_v2 = vld [vmem:[%s167_s1] sm:$0xff]  ;;  %v111_v3 = vmov 0   ;;  %vm56_vm1 = vcmask 7168  }
   0x3   :  { %21 = vadd.xlane.f32.xlu0 %v20_v1  ;;  %83 = vset.pattern.permute.xlu1 %v111_v3  ;;  %v48_v4 = vld [vmem:[%s168_s2] sm:$0xff] }
   0x4   :  { %84 = vset.pattern.permute.xlu0 %v111_v3  ;;  %44 = vperm.xlu1 %83, %v41_v2  }
   0x8   :  { %51 = vperm.xlu1 %83, %v48_v4  }
  0x7f   :  { %v45_v18 = vpop.permute.xlu1 %44 }
  0x83   :  { %v52_v22 = vpop.permute.xlu1 %51 }
  0x8c   :  { %v22_v5 = vpop.xlane.xlu0 %21 }
  0x8d   :  { %v24_v6 = vmul.f32 0.0625, %v22_v5 }
  0x8f   :  { %v25_v7 = vsub.f32 %v18_v0, %v24_v6  ;;  %57 = vst.msk [vmem:[%s170_s4] sm:$0xff] %vm56_vm1, %v24_v6  ;;  %s112_s4 = smov [#allocation2]  }
  0x90   :  { %s65_s25 = sshll.u32 %s112_s4, 4  ;;  %s66_s25 = int_to_ptr.vmem [resolvable:$true] %s65_s25 }
  0x91   :  { %v26_v8 = vmul.f32 %v25_v7, %v25_v7  ;;  %s89_s26 = scalar_lea.vmem %s66_s25, 128  ;;  %p94_p1 = scmp.lt.s32.totalorder %s66_s25, %s66_s25 }
  0x92   :  { %p90_p0 = scmp.ne.s32.totalorder %s66_s25, %s89_s26  ;;  %p95_p2 = scmp.lt.s32.totalorder %s89_s26, %s89_s26 }
  0x93   :  { %v27_v9 = vsel %vm19_vm0, %v26_v8, 0.0 }
  0x94   :  { %28 = vadd.xlane.f32.xlu0 %v27_v9  ;;  %p96_p3 = por %p95_p2, %p94_p1 }
  0x96   :  { %p97_p4 = pnand %p96_p3, %p90_p0 }
 0x11d   :  { %v29_v10 = vpop.xlane.xlu0 %28 }
 0x11e   :  { %v30_v11 = vmul.f32 0.0625, %v29_v10 }
 0x120   :  { %v31_v12 = vadd.f32 1e-05, %v30_v11 }
 0x122   :  { %85 = vrsqrt.f32 %v31_v12  ;;  %vm34_vm2 = vcmp.eq.f32.partialorder %v31_v12, inf  ;;  %v37_v15 = vand.u32 2147483648, %v31_v12  ;;  %vm36_vm3 = vcmp.eq.f32.partialorder %v31_v12, 0.0 }
 0x12f   :  { %v86_v13 = vpop.eup %85 }
 0x130   :  { %v33_v14 = vmul.f32 %v86_v13, %v31_v12 }
 0x132   :  { %v35_v16 = vsel %vm34_vm2, %v31_v12, %v33_v14 }
 0x133   :  { %v38_v17 = vsel %vm36_vm3, %v37_v15, %v35_v16 }
 0x134   :  { %87 = vrcp.f32 %v38_v17  ;;  %58 = vst.msk [vmem:[%s171_s5] sm:$0xff] %vm56_vm1, %v38_v17 }
 0x141   :  { %v88_v19 = vpop.eup %87 }
 0x142   :  { %v40_v20 = vmul.f32 %v88_v19, %v25_v7 }
 0x144   :  { %v47_v21 = vmul.f32 %v45_v18, %v40_v20 }
 0x146   :  { %v54_v23 = vadd.f32 %v52_v22, %v47_v21 }
 0x148   :  { %55 = vst.msk [vmem:[#allocation2] sm:$0xff] %vm19_vm0, %v54_v23 }
 0x149   :  { %100 = shalt.err (!%p97_p4)
}
 0x14a   :  { %68 = dma.vmem_to_hbm [thread:$0]  %s66_s25, 128, %s169_s3, [#allocation3]  }
 0x14b   :  { %109 = dma.done.wait [#allocation3], 128  }
 0x14c   :  { %110 = vsyncadd [#allocation3], 4294967168 }
 0x14d   :  { %80 = vsyncpa [#allocation3], 1 }

</bundles_post_ra>
